<compile_context>
chip_gen: v7x
topology: tpu7x:2x2x1
jax: 0.10.0
libtpu: 0.0.40
codegen_flags: <defaults>
</compile_context>

<pallas_src>
import jax
import jax.numpy as jnp
from jax.experimental import pallas as pl
from jax.experimental.pallas import tpu as pltpu


def _round_up(v, m):
    return (v + m - 1) // m * m


def _round_down(v, m):
    return (v // m) * m


def _onering_matmul_kernel(w_ref, b_ref, mat_ref, o_ref):
    # w_ref:   [C_out, K]   bf16, single VMEM-resident copy across the grid
    # b_ref:   [C_out, 1]   f32,  VMEM-resident
    # mat_ref: [K, tile_n]  gathered neighborhood features, vertices on lanes
    # o_ref:   [C_out, tile_n]
    acc = jnp.dot(w_ref[...], mat_ref[...], preferred_element_type=jnp.float32)
    o_ref[...] = (acc + b_ref[...]).astype(o_ref.dtype)


def _gather_neighborhoods(xc, neigh_orders, n_pad):
    """matT[b, c*7 + j, v] = x[b, c, neigh_orders[v, j]] with padded vertex axis."""
    B, C_in, N = xc.shape
    idx = neigh_orders
    if n_pad != N:
        idx = jnp.pad(idx, ((0, n_pad - N), (0, 0)))   # pad with vertex 0 (valid)
    idx_t = idx.T                                       # [7, N_pad]
    try:
        g = jnp.take(xc, idx_t, axis=2, mode="promise_in_bounds")
    except (TypeError, ValueError):                     # older jnp.take mode sets
        g = jnp.take(xc, idx_t, axis=2)
    return g.reshape(B, C_in * 7, n_pad)                # row index = c*7 + j


def onering_conv_layer_batch(x, neigh_orders, weight, bias, *,
                             tile_n=None, compute_dtype=jnp.bfloat16):
    """Forward pass of NeuroExplainer's onering_conv_layer_batch.

    x:            [B, C_in, N] float
    neigh_orders: [N, 7] int32 vertex indices of the 1-ring (incl. center)
    weight:       [7*C_in, C_out]  (nn.Linear weight pre-transposed; row index
                                    is j*C_in + c, matching mat.view ordering)
    bias:         [C_out]
    returns:      [B, C_out, N] with x.dtype
    """
    B, C_in, N = x.shape
    K, C_out = weight.shape
    assert K == 7 * C_in
    assert neigh_orders.shape == (N, 7)

    out_dtype = x.dtype
    cd_bytes = jnp.dtype(compute_dtype).itemsize
    ob_bytes = jnp.dtype(out_dtype).itemsize

    # ---------- pad the vertex axis to a lane-aligned size ----------
    n_pad = _round_up(N, 128)

    # ---------- glue: neighborhood gather (XLA), kept in [B, C, N] layout ----
    mat_t = _gather_neighborhoods(x.astype(compute_dtype), neigh_orders, n_pad)

    # Re-order weight rows from PyTorch's [j*C_in + c] to the kernel's
    # [c*7 + j] ordering and pre-transpose to [C_out, K] so the vertex axis of
    # the output lands on lanes.
    w_t = (weight.reshape(7, C_in, C_out)
                 .transpose(2, 1, 0)
                 .reshape(C_out, C_in * 7)
                 .astype(compute_dtype))                      # [C_out, K]
    bias2d = bias.reshape(C_out, 1).astype(jnp.float32)       # [C_out, 1]

    # ---------- tiling: vertex dim on lanes, K/C_out-adaptive tile size -----
    # Target ~4 MiB of pipelined (activation + output) bytes per grid step.
    bytes_per_lane = _round_up(K, 16) * cd_bytes + _round_up(C_out, 8) * ob_bytes
    if tile_n is None:
        tn = _round_down(max(128, (4 << 20) // bytes_per_lane), 128)
        tn = min(tn, 16384)
    else:
        tn = _round_up(int(tile_n), 128)
    tn = min(tn, n_pad)
    grid = (B, pl.cdiv(n_pad, tn))

    # ---------- explicit, generation-aware VMEM budget ----------
    try:
        vmem_capacity = int(pltpu.get_tpu_info().vmem_capacity_bytes)
    except Exception:
        vmem_capacity = 64 << 20          # conservative (v7x per-TensorCore)
    vmem_cap = min(vmem_capacity * 5 // 8, 96 << 20)   # ~40 MiB v7x, ~80 MiB v5e/v6e

    in_tile_b = _round_up(K, 16) * tn * cd_bytes
    out_tile_b = _round_up(C_out, 8) * tn * ob_bytes
    w_b = _round_up(C_out, 16) * _round_up(K, 128) * cd_bytes   # single-buffered
    b_b = _round_up(C_out, 8) * 128 * 4
    required = 2 * (in_tile_b + out_tile_b) + w_b + b_b + (2 << 20)  # + headroom
    if required > vmem_cap:
        raise ValueError(
            f"onering_conv_layer_batch tiling needs ~{required >> 20} MiB VMEM "
            f"(> cap {vmem_cap >> 20} MiB for this TPU generation); pass a "
            f"smaller tile_n (current {tn}) or reduce the channel count.")
    vmem_bytes = int(max(16 << 20, required))

    cost = pl.CostEstimate(
        flops=int(2 * B * K * C_out * n_pad),
        transcendentals=0,
        bytes_accessed=int(B * K * n_pad * cd_bytes
                           + B * C_out * n_pad * ob_bytes
                           + C_out * K * cd_bytes + C_out * 4))

    out = pl.pallas_call(
        _onering_matmul_kernel,
        out_shape=jax.ShapeDtypeStruct((B, C_out, n_pad), out_dtype),
        grid=grid,
        in_specs=[
            # Constant index_maps + single buffering: one resident copy each.
            pl.BlockSpec((C_out, K), lambda b, i: (0, 0),
                         pipeline_mode=pl.Buffered(1)),
            pl.BlockSpec((C_out, 1), lambda b, i: (0, 0),
                         pipeline_mode=pl.Buffered(1)),
            pl.BlockSpec((None, K, tn), lambda b, i: (b, 0, i)),   # activations
        ],
        out_specs=pl.BlockSpec((None, C_out, tn), lambda b, i: (b, 0, i)),
        compiler_params=pltpu.CompilerParams(
            dimension_semantics=("parallel", "parallel"),
            vmem_limit_bytes=vmem_bytes),
        cost_estimate=cost,
    )(w_t, bias2d, mat_t)

    if n_pad != N:
        out = out[:, :, :N]
    return out                                                # [B, C_out, N]


def _reference_forward(x, neigh_orders, weight, bias):
    """Plain-JAX replica of the PyTorch forward (f32)."""
    B, C_in, N = x.shape
    xp = jnp.transpose(x, (0, 2, 1))                              # [B, N, C_in]
    mat = jnp.take(xp, neigh_orders.reshape(-1), axis=1)          # [B, N*7, C_in]
    mat = mat.reshape(B, N, 7 * C_in)
    return jnp.transpose(mat @ weight + bias, (0, 2, 1))          # [B, C_out, N]


if __name__ == "__main__":
    key = jax.random.PRNGKey(0)
    kx, kw, kb, kn, kx2, kn2 = jax.random.split(key, 6)

    # ---- case 1: lane-aligned vertex count, multiple tiles per batch ----
    B, C_in, C_out, N = 2, 4, 8, 256
    fan_in = 7 * C_in
    bound = 1.0 / jnp.sqrt(jnp.float32(fan_in))

    x = jax.random.normal(kx, (B, C_in, N), dtype=jnp.float32)
    neigh_orders = jax.random.randint(kn, (N, 7), 0, N, dtype=jnp.int32)
    weight = jax.random.uniform(kw, (fan_in, C_out), minval=-bound, maxval=bound,
                                dtype=jnp.float32)
    bias = jax.random.uniform(kb, (C_out,), minval=-bound, maxval=bound,
                              dtype=jnp.float32)

    out = onering_conv_layer_batch(x, neigh_orders, weight, bias, tile_n=128)
    out = jax.block_until_ready(out)
    assert out.shape == (B, C_out, N)

    # Strict check against a reference that uses the same bf16-quantized
    # inputs (isolates kernel math; only accumulation order differs).
    x_q = x.astype(jnp.bfloat16).astype(jnp.float32)
    w_q = weight.astype(jnp.bfloat16).astype(jnp.float32)
    ref_q = _reference_forward(x_q, neigh_orders, w_q, bias)
    assert jnp.allclose(out, ref_q, atol=1e-3, rtol=1e-3)

    # Loose check against the pure-f32 PyTorch semantics (bf16 compression is
    # an intentional perf choice; accumulation stays f32).
    ref = _reference_forward(x, neigh_orders, weight, bias)
    assert jnp.allclose(out, ref, atol=6e-2, rtol=6e-2)

    # ---- case 2: real icosahedron vertex count (162 -> padded to 256) ----
    N2 = 162
    x2 = jax.random.normal(kx2, (B, C_in, N2), dtype=jnp.float32)
    neigh2 = jax.random.randint(kn2, (N2, 7), 0, N2, dtype=jnp.int32)
    out2 = jax.block_until_ready(
        onering_conv_layer_batch(x2, neigh2, weight, bias))   # auto tile_n
    assert out2.shape == (B, C_out, N2)
    ref2_q = _reference_forward(x2.astype(jnp.bfloat16).astype(jnp.float32),
                                neigh2, w_q, bias)
    assert jnp.allclose(out2, ref2_q, atol=1e-3, rtol=1e-3)

    print("KERNEL_OK")
</pallas_src>

<mosaic_0001>
module attributes {stable_mosaic.version = 11 : i64} {
  func.func @_onering_matmul_kernel(%arg0: i32, %arg1: i32, %arg2: memref<8x28xbf16, #tpu.memory_space<vmem>>, %arg3: memref<8x1xf32, #tpu.memory_space<vmem>>, %arg4: memref<1x28x128xbf16, #tpu.memory_space<vmem>>, %arg5: memref<1x8x128xf32, #tpu.memory_space<vmem>>) attributes {dimension_semantics = [#tpu.dimension_semantics<parallel>, #tpu.dimension_semantics<parallel>], iteration_bounds = array<i64: 2, 2>, scalar_prefetch = 0 : i64, scratch_operands = 0 : i64, tpu.core_type = #tpu.core_type<tc>, window_params = [{pipeline_mode = #tpu.pipeline_mode<synchronous>, transform_indices = @transform_0, window_bounds = array<i64: 8, 28>}, {pipeline_mode = #tpu.pipeline_mode<synchronous>, transform_indices = @transform_1, window_bounds = array<i64: 8, 1>}, {transform_indices = @transform_2, window_bounds = array<i64: 1, 28, 128>}, {transform_indices = @transform_3, window_bounds = array<i64: 1, 8, 128>}]} {
    %c0 = arith.constant 0 : index
    %c0_0 = arith.constant 0 : index
    %0 = vector.load %arg2[%c0, %c0_0] : memref<8x28xbf16, #tpu.memory_space<vmem>>, vector<8x28xbf16>
    %c0_1 = arith.constant 0 : index
    %c0_2 = arith.constant 0 : index
    %c0_3 = arith.constant 0 : index
    %1 = vector.load %arg4[%c0_1, %c0_2, %c0_3] : memref<1x28x128xbf16, #tpu.memory_space<vmem>>, vector<1x28x128xbf16>
    %2 = vector.shape_cast %1 : vector<1x28x128xbf16> to vector<28x128xbf16>
    %cst = arith.constant dense<0.000000e+00> : vector<8x128xf32>
    %3 = tpu.matmul %0, %2, %cst {dimension_numbers = #tpu.dot_dimension_numbers<[1], [0], [0], [1], [0, 0, 1, 1], [], []>} : vector<8x28xbf16>, vector<28x128xbf16>, vector<8x128xf32> -> vector<8x128xf32>
    %c0_4 = arith.constant 0 : index
    %c0_5 = arith.constant 0 : index
    %4 = vector.load %arg3[%c0_4, %c0_5] : memref<8x1xf32, #tpu.memory_space<vmem>>, vector<8x1xf32>
    %5 = vector.broadcast %4 : vector<8x1xf32> to vector<8x128xf32>
    %6 = arith.addf %3, %5 : vector<8x128xf32>
    %c0_6 = arith.constant 0 : index
    %c0_7 = arith.constant 0 : index
    %c0_8 = arith.constant 0 : index
    %7 = vector.load %arg5[%c0_6, %c0_7, %c0_8] : memref<1x8x128xf32, #tpu.memory_space<vmem>>, vector<1x8x128xf32>
    %8 = vector.shape_cast %7 : vector<1x8x128xf32> to vector<8x128xf32>
    %9 = vector.shape_cast %6 : vector<8x128xf32> to vector<1x8x128xf32>
    tpu.vector_store %arg5[%c0_6, %c0_7, %c0_8], %9 {strides = array<i32>} : memref<1x8x128xf32, #tpu.memory_space<vmem>>, vector<1x8x128xf32>,
    return
  }
  func.func @transform_0(%arg0: i32, %arg1: i32) -> (i32, i32) {
    %c0_i32 = arith.constant 0 : i32
    %c0_i32_0 = arith.constant 0 : i32
    %c0_i32_1 = arith.constant 0 : i32
    return %c0_i32, %c0_i32_0 : i32, i32
  }
  func.func @transform_1(%arg0: i32, %arg1: i32) -> (i32, i32) {
    %c0_i32 = arith.constant 0 : i32
    %c0_i32_0 = arith.constant 0 : i32
    %c0_i32_1 = arith.constant 0 : i32
    return %c0_i32, %c0_i32_0 : i32, i32
  }
  func.func @transform_2(%arg0: i32, %arg1: i32) -> (i32, i32, i32) {
    %c0_i32 = arith.constant 0 : i32
    %c0_i32_0 = arith.constant 0 : i32
    return %arg0, %c0_i32, %arg1 : i32, i32, i32
  }
  func.func @transform_3(%arg0: i32, %arg1: i32) -> (i32, i32, i32) {
    %c0_i32 = arith.constant 0 : i32
    %c0_i32_0 = arith.constant 0 : i32
    return %arg0, %c0_i32, %arg1 : i32, i32, i32
  }
}

</mosaic_0001>

<bundles_post_ra>
// kernel: tpu_custom_call.1
= control target key start
LH: loop header
LB: loop body
LE: loop exit
PB: predicated region body
PF: predicated region fallthrough
CT: control target
= control target key end

     0   :  { %8 = vsyncpa [#allocation4], 0  ;;  %s789_s0 = inlined_call_operand.vmem [shape: bf16[8,28], index: 0, kind: input, shape index: {}]   ;;  %s790_s1 = inlined_call_operand.vmem [shape: f32[8,1], index: 1, kind: input, shape index: {}]   ;;  %s791_s2 = inlined_call_operand.vmem [shape: bf16[2,28,256], index: 2, kind: input, shape index: {}]   ;;  %s792_s3 = inlined_call_operand.hbm [shape: f32[2,8,256], index: 3, kind: output, shape index: {}]  }
   0x1   :  { %10 = vsyncpa [#allocation4 + $0x1], 0  ;;  %s634_s12 = smov 0   ;;  %s636_s13 = smov 0  }
   0x2   :  { %s638_s14 = smov 0   ;;  %s640_s15 = smov 0  }
   0x3   :  { %s642_s16 = smov 0   ;;  %s644_s17 = smov 0  }
   0x4   :  { %s646_s18 = smov 0   ;;  %s648_s19 = smov 0  }
   0x5 LB: > { %s408_s20 = sadd.s32 4294967295, %s608_s19   ;;  %s409_s21 = sadd.s32 4294967294, %s608_s19   ;;  %s608_s19 = sphi %s648_s19, %s16_s19   ;;  %s604_s18 = sphi %s646_s18, %s802_s18   ;;  %s600_s17 = sphi %s644_s17, %s801_s17   ;;  %s596_s16 = sphi %s642_s16, %s800_s16   ;;  %s592_s15 = sphi %s640_s15, %s799_s15   ;;  %s588_s14 = sphi %s638_s14, %s798_s14   ;;  %s584_s13 = sphi %s636_s13, %s797_s13   ;;  %s580_s12 = sphi %s634_s12, %s796_s12  }
   0x6   : > { %s25_s22 = sadd.s32 1, %s600_s17  ;;  %s28_s23 = sadd.s32 1, %s604_s18 }
   0x7   : > { %p26_p0 = scmp.ge.s32.totalorder %s25_s22, 2  ;;  %p86_p1 = scmp.ne.s32.totalorder %s588_s14, %s584_s13 }
   0x8   : > { %p87_p2 = scmp.eq.s32.totalorder %s608_s19, 0  ;;  %p118_p5 = scmp.eq.s32.totalorder %s408_s20, 3 }
   0x9   : > { %s804_s22 = smov (%p26_p0, %s25_s22), 0  ;;  %s806_s23 = smov (!%p26_p0, %s28_s23), %s604_s18 }
   0xa   : > { %s75_s24 = ssub.s32 %s600_s17, %s804_s22  ;;  %p686_p3 = por %p87_p2, %p86_p1 }
   0xb   : > { %p30_p4 = scmp.ge.s32.totalorder %s806_s23, 2  ;;  %p123_p6 = scmp.ne.s32.totalorder %s584_s13, %s580_s12 }
   0xc   : > { %p124_p7 = scmp.eq.s32.totalorder %s409_s21, 3  ;;  %p694_p8 = por %p118_p5, %p86_p1 }
   0xd   : > { %s808_s23 = smov (%p30_p4, %s806_s23), 0  ;;  %s79_s30 = sadd.s32 1, %s588_s14 }
   0xe   : > { %p698_p9 = por %p124_p7, %p123_p6  ;;  %s74_s28 = ssub.s32 %s604_s18, %s808_s23 }
   0xf   : > { %s76_s29 = sor.u32 %s75_s24, %s74_s28  ;;  %p411_p11 = scmp.ge.s32.totalorder %s608_s19, 4 }
  0x10   : > { %p77_p10 = scmp.eq.s32.totalorder %s76_s29, 0 }
  0x11   : > { %146 = sbr.rel (%p411_p11) target bundleno = 32 (0x20), region = 24 }
  0x12   : > { %s706_s4 = scalar_select %p77_p10, %s588_s14, %s79_s30  }
  0x18   : > { %149 = sbr.rel (!%p686_p3) target bundleno = 32 (0x20), region = 28  ;;  %s151_s5 = sand.u32 (%p686_p3), 1, %s588_s14  }
  0x19   : > { %s413_s6 = sshll.u32 (%p686_p3), %s604_s18, 3  ;;  %s412_s7 = sshll.u32 (%p686_p3), %s151_s5, 4 }
  0x1a   : > { %s155_s8 = sadd.s32 (%p686_p3), %s600_s17, %s413_s6  ;;  %s153_s21 = scalar_lea.vmem (%p686_p3), [#allocation2], %s412_s7 }
  0x1b   : > { %s414_s9 = sshll.u32 (%p686_p3), %s155_s8, 2 }
  0x1c   : > { %s157_s20 = scalar_lea.vmem (%p686_p3), %s791_s2, %s414_s9 }
  0x1d   : > { %v173_v0 = vld [vmem:[%s157_s20] sm:$0xf] (%p686_p3)  ;;  %v175_v1 = vld [vmem:[%s157_s20 + $0x8] sm:$0xf] (%p686_p3)  ;;  %v177_v2 = vld [vmem:[%s157_s20 + $0x10] sm:$0xf] (%p686_p3) }
  0x1e   : > { %174 = vst [vmem:[%s153_s21] sm:$0xf] (%p686_p3), %v173_v0  ;;  %176 = vst [vmem:[%s153_s21 + $0x4] sm:$0xf] (%p686_p3), %v175_v1  ;;  %v179_v3 = vld [vmem:[%s157_s20 + $0x18] sm:$0xf] (%p686_p3) }
  0x1f   : > { %178 = vst [vmem:[%s153_s21 + $0x8] sm:$0xf] %v177_v2  ;;  %180 = vst [vmem:[%s153_s21 + $0xc] sm:$0xf] %v179_v3 }
  0x20 PF: > { %p415_p12 = scmp.ge.s32.totalorder %s608_s19, 1  ;;  %p210_p13 = scmp.lt.s32.totalorder %s608_s19, 5 }
  0x22   : > { %p211_p0 = pnand %p415_p12, %p210_p13 }
  0x23   : > { %s720_s24 = sand.u32 (!%p211_p0), 1, %s584_s13   ;;  %v610_v4 = vmov (!%p211_p0), 0.0   ;;  %vm611_vm0 = vmmov (!%p211_p0), 0   ;;  %v246_v5 = vld [vmem:[%s790_s1] sm:$0xff] (!%p211_p0)  ;;  %v612_v6 = vmov (!%p211_p0), 0   ;;  %vm267_vm1 = vcmask (!%p211_p0), 1045504  }
  0x24   : > { %214 = sbr.rel (%p211_p0) target bundleno = 274 (0x112), region = 69  ;;  %429 = vmatprep.subr.bf16.mxu0 (!%p211_p0), %v610_v4  ;;  %s416_s25 = sshll.u32 (!%p211_p0), %s720_s24, 4  ;;  %433 = vmatprep.mubr.msk.bf16.mxu0 (!%p211_p0), %vm611_vm0, %v610_v4  ;;  %v241_v10 = vld [vmem:[%s789_s0] sm:$0xf] (!%p211_p0)  ;;  %vm263_vm2 = vcmask (!%p211_p0), 228352  }
  0x25   : > { %511 = vset.pattern.permute.xlu0 (!%p211_p0), %v612_v6  ;;  %s219_s30 = scalar_lea.vmem (!%p211_p0), [#allocation2], %s416_s25  ;;  %s417_s7 = sshll.u32 (!%p211_p0), %s720_s24, 3 }
  0x26   : > { %v512_v7 = vld [vmem:[%s219_s30] sm:$0xff] (!%p211_p0)   ;;  %249 = vperm.xlu0 (!%p211_p0), %511, %v246_v5   ;;  %v513_v8 = vld [vmem:[%s219_s30 + $0x8] sm:$0x3f] (!%p211_p0)   ;;  %s422_s8 = sshll.u32 (!%p211_p0), %s596_s16, 1  ;;  %s239_s11 = scalar_lea.vmem (!%p211_p0), [#allocation3], %s417_s7 }
  0x27   : > { %430 = vmatpush3.bf16.msra.mxu0 (!%p211_p0), %v512_v7  ;;  %v269_v9 = vsel (!%p211_p0), %vm267_vm1, %v513_v8, 0  ;;  %s324_s9 = sadd.s32 (!%p211_p0), %s592_s15, %s422_s8  ;;  %s328_s20 = sshll.u32 (!%p211_p0), %s239_s11, 4  ;;  %s737_s20 = int_to_ptr.vmem [resolvable:$true] %s328_s20 }
  0x28   : > { %431 = vmatprep.subr.bf16.mxu0 (!%p211_p0), %v610_v4  ;;  %s423_s10 = sshll.u32 (!%p211_p0), %s324_s9, 7  ;;  %s313_s15 = scalar_lea.sflag (!%p211_p0), [#allocation4], %s720_s24 }
  0x29   : > { %s735_s28 = scalar_lea.hbm (!%p211_p0), %s792_s3, %s423_s10  ;;  %s514_s16 = scalar_lea.vmem (!%p211_p0), %s737_s20, 128 }
  0x2a   : > { %p515_p1 = scmp.ne.s32.totalorder (!%p211_p0), %s737_s20, %s514_s16  ;;  %s613_s29 = smov (!%p211_p0), [#allocation3]  }
  0x2b   : > { %432 = vmatpush3.bf16.msra.mxu0 %v269_v9  ;;  %s518_s30 = sshll.u32 %s613_s29, 4  ;;  %s519_s30 = int_to_ptr.vmem [resolvable:$false] %s518_s30 }
  0x2c   : > { %p516_p2 = pnand %p515_p1, %p694_p8  ;;  %s520_s5 = scalar_lea.vmem %s519_s30, 256 }
  0x2d   : > { %p521_p4 = scmp.lt.s32.totalorder %s737_s20, %s519_s30  ;;  %p522_p5 = scmp.lt.s32.totalorder %s520_s5, %s514_s16 }
  0x2e   : > { %434 = vmatmul.mubr.msk.bf16.vlgmr.msra.gmra.mrb[0].mxu0 %vm263_vm2, %v241_v10  ;;  %p517_p3 = pneg %p516_p2 }
  0x2f   : > { %p523_p6 = por %p522_p5, %p521_p4 }
  0x31   : > { %p524_p7 = pnand %p523_p6, %p517_p3 }
  0xa5   : > { %v250_v11 = vpop.permute.xlu0 %249 }
 0x101   : > { %v305_v12 = vpop.f32.mrb[0].mxu0 }
 0x102   : > { %v306_v13 = vadd.f32 %v305_v12, %v250_v11  ;;  %v435_v14 = vpop.f32.mrb[1].mxu0 }
 0x103   : > { %v308_v15 = vpop.f32.mrb[2].mxu0 }
 0x104   : > { %311 = vst [vmem:[%s239_s11] sm:$0xff] %v306_v13  ;;  %v436_v16 = vpop.f32.mrb[3].mxu0 }
 0x105   : > { %527 = shalt.err (!%p524_p7)
}
 0x106   : > { %s528_s24 = scalar_lea.hbm %s735_s28, 128  ;;  %s532_s8 = scalar_lea.hbm %s792_s3, 512 }
 0x107   : > { %p529_p10 = scmp.ne.s32.totalorder %s735_s28, %s528_s24  ;;  %p533_p13 = scmp.lt.u32.totalorder %s735_s28, %s792_s3 }
 0x108   : > { %p534_p0 = scmp.lt.u32.totalorder %s532_s8, %s528_s24  ;;  %p536_p2 = scmp.lt.u32.totalorder %s528_s24, %s735_s28 }
 0x109   : > { %p530_p11 = pnand %p529_p10, %p694_p8 }
 0x10a   : > { %p535_p1 = por %p534_p0, %p533_p13 }
 0x10b   : > { %p531_p12 = pneg %p530_p11 }
 0x10c   : > { %p537_p3 = por %p536_p2, %p535_p1 }
 0x10e   : > { %p538_p4 = pnand %p537_p3, %p531_p12 }
 0x110   : > { %541 = shalt.err (!%p538_p4)
}
 0x111   : > { %437 = dma.vmem_to_hbm [thread:$0]  (%p694_p8), %s737_s20, 128, %s735_s28, %s313_s15  }
 0x112 PF: > { %p443_p5 = scmp.ge.s32.totalorder %s608_s19, 2  ;;  %s340_s11 = sand.u32 1, %s580_s12  }
 0x113   : > { %s341_s21 = scalar_lea.sflag [#allocation4], %s340_s11 }
 0x114   : > { %p440_p6 = pnand %p443_p5, %p698_p9 }
 0x116   : > { %575 = dma.done.wait (!%p440_p6), %s341_s21, 128  }
 0x117   : > { %577 = vsyncadd (!%p440_p6), %s341_s21, 4294967168  ;;  %s16_s19 = sadd.s32 1, %s608_s19   ;;  %s796_s12 = smov %s584_s13 }
 0x118   : > { %p13_p7 = scmp.ge.s32.totalorder %s16_s19, 6   ;;  %s797_s13 = smov %s588_s14 }
 0x119   : > { %s798_s14 = smov %s706_s4  ;;  %s799_s15 = smov %s600_s17 }
 0x11a   : > { %s800_s16 = smov %s604_s18  ;;  %s801_s17 = smov %s804_s22 }
 0x11b   : > { %s802_s18 = smov %s808_s23  ;;  %15 = sbr.rel (!%p13_p7) target bundleno = 5 (0x5), region = 113 }
 0x122   :  { %346 = vsyncpa [#allocation4], 1 }
 0x123   :  { %348 = vsyncpa [#allocation4 + $0x1], 1 }

</bundles_post_ra>
